<compile_context>
chip_gen: v6e
topology: v6e:2x2x1
jax: 0.10.0
libtpu: 0.0.40
codegen_flags: <defaults>
</compile_context>

<pallas_src>
import jax
import jax.numpy as jnp
from jax.experimental import pallas as pl
from jax.experimental.pallas import tpu as pltpu

_LANES = 128                 # vreg lane width; last dim is exactly lane-aligned
_VREG_ELEMS = 8 * _LANES     # one f32 vreg worth of elements (1024)


def _h_sigmoid_kernel(x_ref, o_ref):
    # Compute in f32 (v5e VPU has no native bf16), store in the output dtype.
    x = x_ref[...].astype(jnp.float32)
    y = jnp.clip(x + 3.0, 0.0, 6.0) * (1.0 / 6.0)
    o_ref[...] = y.astype(o_ref.dtype)


def _h_sigmoid_math(x):
    """Plain-jnp h_sigmoid in f32, cast back to the input dtype (tail path)."""
    return (jnp.clip(x.astype(jnp.float32) + 3.0, 0.0, 6.0) * (1.0 / 6.0)).astype(x.dtype)


def h_sigmoid(x, *, target_block_bytes=2 * 1024 * 1024):
    """Elementwise relu6(x + 3) / 6, matching the PyTorch h_sigmoid module.

    Works for any floating input shape/dtype; repacks to a dense (rows, 128)
    layout and tiles the row axis (~2 MiB per buffer) for DMA/compute overlap.
    """
    orig_shape = x.shape
    dtype = x.dtype
    assert jnp.issubdtype(dtype, jnp.floating), "h_sigmoid expects a floating dtype"

    n = x.size
    if n == 0:
        return x

    flat = jnp.ravel(x)
    itemsize = jnp.dtype(dtype).itemsize
    # Sublane multiple for tile-legal blocks: 8 rows for 4-byte, 16 for 2-byte,
    # 32 for 1-byte dtypes.
    sub = {4: 8, 2: 16, 1: 32}.get(itemsize, 8)

    # 1024-aligned bulk goes through the kernel; the (<1024-element) tail is
    # handled with plain jnp — far cheaper than padding + slicing the whole
    # array on non-aligned sizes.
    n_bulk = (n // _VREG_ELEMS) * _VREG_ELEMS

    pieces = []
    if n_bulk:
        rows = n_bulk // _LANES                      # always a multiple of 8
        block_rows_target = max(
            sub, (target_block_bytes // (_LANES * itemsize)) // sub * sub
        )
        if rows <= block_rows_target:
            block_rows = rows                        # single block == full dim (tile-legal)
        else:
            block_rows = block_rows_target           # multiple of `sub`
        grid = (pl.cdiv(rows, block_rows),)          # ragged final block is masked by Pallas

        x2 = flat[:n_bulk].reshape(rows, _LANES)
        out2 = pl.pallas_call(
            _h_sigmoid_kernel,
            out_shape=jax.ShapeDtypeStruct((rows, _LANES), dtype),
            grid=grid,
            in_specs=[pl.BlockSpec((block_rows, _LANES), lambda i: (i, 0))],
            out_specs=pl.BlockSpec((block_rows, _LANES), lambda i: (i, 0)),
            compiler_params=pltpu.CompilerParams(
                dimension_semantics=("parallel",),
            ),
            cost_estimate=pl.CostEstimate(
                flops=4 * n_bulk,
                transcendentals=0,
                bytes_accessed=2 * n_bulk * itemsize,
            ),
        )(x2)
        pieces.append(out2.reshape(-1))

    if n_bulk != n:
        pieces.append(_h_sigmoid_math(flat[n_bulk:]))

    out_flat = pieces[0] if len(pieces) == 1 else jnp.concatenate(pieces)
    return out_flat.reshape(orig_shape)


def h_sigmoid_reference(x):
    """Plain-JAX reference matching the PyTorch forward."""
    return jnp.clip(x.astype(jnp.float32) + 3.0, 0.0, 6.0) / 6.0


if __name__ == "__main__":
    key = jax.random.PRNGKey(0)
    k1, k2, k3 = jax.random.split(key, 3)

    # 1) f32 NCHW activations, 1024-multiple element count (single block).
    x = jax.random.normal(k1, (2, 4, 16, 16), jnp.float32) * 4.0
    out = jax.block_until_ready(h_sigmoid(x))
    ref = h_sigmoid_reference(x)
    assert out.shape == x.shape and out.dtype == x.dtype
    assert jnp.allclose(out, ref, atol=1e-6, rtol=1e-6), "f32 mismatch vs reference"

    # 2) Ragged-grid path: a tiny block target forces a masked final block
    #    (72 rows, block_rows=32, grid=3).
    x2 = jax.random.normal(k2, (2, 3, 24, 64), jnp.float32) * 4.0
    out2 = jax.block_until_ready(h_sigmoid(x2, target_block_bytes=32 * _LANES * 4))
    ref2 = h_sigmoid_reference(x2)
    assert out2.shape == x2.shape and out2.dtype == x2.dtype
    assert jnp.allclose(out2, ref2, atol=1e-6, rtol=1e-6), "ragged-block mismatch"

    # 3) bf16 I/O with a non-1024-multiple element count: exercises the
    #    kernel bulk + plain-jnp tail + concat path.
    xb = (jax.random.normal(k3, (2, 5, 11, 16), jnp.float32) * 4.0).astype(jnp.bfloat16)
    outb = jax.block_until_ready(h_sigmoid(xb))
    refb = h_sigmoid_reference(xb).astype(jnp.bfloat16)
    assert outb.shape == xb.shape and outb.dtype == jnp.bfloat16
    assert jnp.allclose(
        outb.astype(jnp.float32), refb.astype(jnp.float32), atol=1e-2, rtol=1e-2
    ), "bf16 mismatch vs reference"

    print("KERNEL_OK")
</pallas_src>

<mosaic_0001>
module attributes {stable_mosaic.version = 11 : i64} {
  func.func @_h_sigmoid_kernel(%arg0: i32, %arg1: memref<16x128xf32, #tpu.memory_space<vmem>>, %arg2: memref<16x128xf32, #tpu.memory_space<vmem>>) attributes {dimension_semantics = [#tpu.dimension_semantics<parallel>], iteration_bounds = array<i64: 1>, scalar_prefetch = 0 : i64, scratch_operands = 0 : i64, tpu.core_type = #tpu.core_type<tc>, window_params = [{transform_indices = @transform_0, window_bounds = array<i64: 16, 128>}, {transform_indices = @transform_1, window_bounds = array<i64: 16, 128>}]} {
    %c0 = arith.constant 0 : index
    %c0_0 = arith.constant 0 : index
    %0 = vector.load %arg1[%c0, %c0_0] : memref<16x128xf32, #tpu.memory_space<vmem>>, vector<16x128xf32>
    %cst = arith.constant 3.000000e+00 : f32
    %1 = vector.broadcast %cst : f32 to vector<16x128xf32>
    %2 = arith.addf %0, %1 : vector<16x128xf32>
    %cst_1 = arith.constant 0.000000e+00 : f32
    %cst_2 = arith.constant 6.000000e+00 : f32
    %3 = vector.broadcast %cst_1 : f32 to vector<16x128xf32>
    %4 = arith.maximumf %3, %2 : vector<16x128xf32>
    %5 = vector.broadcast %cst_2 : f32 to vector<16x128xf32>
    %6 = arith.minimumf %5, %4 : vector<16x128xf32>
    %cst_3 = arith.constant 0.166666672 : f32
    %7 = vector.broadcast %cst_3 : f32 to vector<16x128xf32>
    %8 = arith.mulf %6, %7 : vector<16x128xf32>
    %c0_4 = arith.constant 0 : index
    %c0_5 = arith.constant 0 : index
    %9 = vector.load %arg2[%c0_4, %c0_5] : memref<16x128xf32, #tpu.memory_space<vmem>>, vector<16x128xf32>
    tpu.vector_store %arg2[%c0_4, %c0_5], %8 {strides = array<i32>} : memref<16x128xf32, #tpu.memory_space<vmem>>, vector<16x128xf32>,
    return
  }
  func.func @transform_0(%arg0: i32) -> (i32, i32) {
    %c0_i32 = arith.constant 0 : i32
    %c0_i32_0 = arith.constant 0 : i32
    return %arg0, %c0_i32 : i32, i32
  }
  func.func @transform_1(%arg0: i32) -> (i32, i32) {
    %c0_i32 = arith.constant 0 : i32
    %c0_i32_0 = arith.constant 0 : i32
    return %arg0, %c0_i32 : i32, i32
  }
}

</mosaic_0001>

<bundles_post_ra>
// kernel: tpu_custom_call.1
= control target key start
LH: loop header
LB: loop body
LE: loop exit
PB: predicated region body
PF: predicated region fallthrough
CT: control target
= control target key end

     0   :  { %6 = vsyncpa [#allocation3], 0  ;;  %s126_s0 = inlined_call_operand.hbm [shape: f32[16,128], index: 0, kind: input, shape index: {}]   ;;  %s127_s1 = inlined_call_operand.hbm [shape: f32[16,128], index: 1, kind: output, shape index: {}]  }
   0x1   :  { %7 = vsyncpa [#allocation4], 0  ;;  %s100_s6 = smov [#allocation2]  }
   0x2   :  { %s13_s7 = sshll.u32 %s100_s6, 4  ;;  %s14_s7 = int_to_ptr.vmem [resolvable:$true] %s13_s7 }
   0x3   :  { %s64_s8 = scalar_lea.vmem %s14_s7, 256  ;;  %p69_p1 = scmp.lt.s32.totalorder %s14_s7, %s14_s7 }
   0x4   :  { %p65_p0 = scmp.ne.s32.totalorder %s14_s7, %s64_s8  ;;  %p70_p2 = scmp.lt.s32.totalorder %s64_s8, %s64_s8 }
   0x6   :  { %p71_p3 = por %p70_p2, %p69_p1 }
   0x8   :  { %p72_p4 = pnand %p71_p3, %p65_p0 }
   0xa   :  { %75 = shalt.err (!%p72_p4)
}
   0xb   :  { %s101_s9 = smov 128   ;;  %s102_s10 = smov 8  }
   0xc   :  { %19 = dma.hbm_to_vmem [thread:$0]  %s126_s0, 256, %s14_s7, [#allocation3], %s101_s9, %s101_s9, %s102_s10  }
   0xd   :  { %96 = dma.done.wait [#allocation3], 256  }
   0xe   :  { %97 = vsyncadd [#allocation3], 4294967040  ;;  %v23_v0 = vld [vmem:[#allocation2] sm:$0xff]  ;;  %v24_v1 = vld [vmem:[#allocation2 + $0x8] sm:$0xff]  ;;  %s103_s13 = smov [#allocation5]  }
   0xf   :  { %v25_v2 = vadd.f32 3.0, %v23_v0  ;;  %v26_v3 = vadd.f32 3.0, %v24_v1  ;;  %s40_s14 = sshll.u32 %s103_s13, 4  ;;  %s41_s14 = int_to_ptr.vmem [resolvable:$true] %s40_s14 }
  0x10   :  { %s76_s15 = scalar_lea.vmem %s41_s14, 256  ;;  %p81_p6 = scmp.lt.s32.totalorder %s41_s14, %s41_s14 }
  0x11   :  { %v27_v4 = vmax.f32 %v25_v2, 0.0  ;;  %v28_v5 = vmax.f32 %v26_v3, 0.0  ;;  %p77_p5 = scmp.ne.s32.totalorder %s41_s14, %s76_s15  ;;  %p82_p7 = scmp.lt.s32.totalorder %s76_s15, %s76_s15 }
  0x13   :  { %v29_v6 = vmin.f32 %v27_v4, 6.0  ;;  %v30_v7 = vmin.f32 %v28_v5, 6.0  ;;  %p83_p8 = por %p82_p7, %p81_p6 }
  0x15   :  { %v31_v8 = vmul.f32 0.16666667, %v29_v6  ;;  %v32_v9 = vmul.f32 0.16666667, %v30_v7  ;;  %p84_p9 = pnand %p83_p8, %p77_p5 }
  0x17   :  { %33 = vst [vmem:[#allocation5] sm:$0xff] %v31_v8  ;;  %34 = vst [vmem:[#allocation5 + $0x8] sm:$0xff] %v32_v9 }
  0x18   :  { %87 = shalt.err (!%p84_p9)
}
  0x19   :  { %46 = dma.vmem_to_hbm [thread:$0]  %s41_s14, 256, %s127_s1, [#allocation4], %s101_s9, %s101_s9, %s102_s10  }
  0x1a   :  { %98 = dma.done.wait [#allocation4], 256  }
  0x1b   :  { %99 = vsyncadd [#allocation4], 4294967040 }
  0x1c   :  { %50 = vsyncpa [#allocation3], 1 }
  0x1d   :  { %51 = vsyncpa [#allocation4], 1 }

</bundles_post_ra>
